<compile_context>
chip_gen: v6e
topology: v6e:2x2x1
jax: 0.10.0
libtpu: 0.0.40
codegen_flags: <defaults>
</compile_context>

<pallas_src>
import math

import jax
import jax.numpy as jnp
from jax.experimental import pallas as pl
from jax.experimental.pallas import tpu as pltpu


def _encoder_lstm_kernel(ids_ref, emb_ref, state0_ref, wih_ref, whh_ref, bias_ref,
                         h_slab_ref, final_ref, x_scr):
    """Embedding gather + hoisted input projection + T-step LSTM recurrence (batch=1).

    ids_ref   : (T,)    int32 token ids (SMEM)
    emb_ref   : (V, E)  f32 embedding table, fully VMEM-resident
    state0_ref: (2, H)  f32 initial [h0; c0]
    wih_ref   : (E, 4H) f32 W_ih^T
    whh_ref   : (H, 4H) f32 W_hh^T
    bias_ref  : (1, 4H) f32 b_ih + b_hh
    h_slab_ref: (T, H)  f32 per-step hidden states (single lane-dense writeback)
    final_ref : (2, H)  f32 final [h_T; c_T]
    x_scr     : (T, E)  f32 VMEM scratch holding the gathered embedding rows
    """
    T = ids_ref.shape[0]
    H = state0_ref.shape[-1]

    # 1) Gather all T embedding rows from the resident table (off the recurrence chain).
    for t in range(T):
        x_scr[pl.ds(t, 1), :] = emb_ref[pl.ds(ids_ref[t], 1), :]

    # 2) Hoisted input projection + bias for the whole sequence: one (T,E)@(E,4H) matmul.
    xp = jnp.dot(x_scr[...], wih_ref[...],
                 preferred_element_type=jnp.float32) + bias_ref[...]          # (T, 4H)

    # 3) Sequential recurrence, fully unrolled (T is a small static trip count).
    #    Per step only the (1,H)@(H,4H) recurrent matmul + gate math sits on the chain.
    h = state0_ref[0:1, :]                                                    # (1, H) f32
    c = state0_ref[1:2, :]                                                    # (1, H) f32
    # TODO(synk): benchmark pltpu.matmul_push_rhs(W_hh)/matmul_acc_lhs (or a VPU broadcast-FMA
    # variant) for the M=1 recurrent matmul; jnp.dot re-streams the weight tile each step.
    for t in range(T):
        gates = xp[t:t + 1, :] + jnp.dot(h, whh_ref[...],
                                         preferred_element_type=jnp.float32)  # (1, 4H)
        # Two whole-vreg transcendental passes; slice the gates afterwards (torch order i,f,g,o).
        sig = jax.nn.sigmoid(gates)
        tnh = jnp.tanh(gates)
        i_g = sig[:, 0 * H:1 * H]
        f_g = sig[:, 1 * H:2 * H]
        g_g = tnh[:, 2 * H:3 * H]
        o_g = sig[:, 3 * H:4 * H]
        c = f_g * c + i_g * g_g
        h = o_g * jnp.tanh(c)
        h_slab_ref[pl.ds(t, 1), :] = h

    final_ref[0:1, :] = h
    final_ref[1:2, :] = c


def lstm_encode_sequence(token_ids, h0, c0, embedding, w_ih_t, w_hh_t, bias):
    """Embedding lookup + LSTM recurrence for all T tokens in ONE pallas_call (no grid).

    token_ids: (T,) int32
    h0, c0:    anything reshaping to (1, H)
    embedding: (V, E) f32
    w_ih_t:    (E, 4H) f32
    w_hh_t:    (H, 4H) f32
    bias:      (1, 4H) f32  (= b_ih + b_hh)
    returns (h_slab (T, H) f32, final (2, H) f32 = [h_T; c_T])
    """
    T = token_ids.shape[0]
    V, E = embedding.shape
    H = w_hh_t.shape[0]
    state0 = jnp.concatenate(
        [h0.reshape(1, H), c0.reshape(1, H)], axis=0).astype(jnp.float32)     # (2, H)

    h_slab, final = pl.pallas_call(
        _encoder_lstm_kernel,
        out_shape=(
            jax.ShapeDtypeStruct((T, H), jnp.float32),
            jax.ShapeDtypeStruct((2, H), jnp.float32),
        ),
        in_specs=[
            pl.BlockSpec(memory_space=pltpu.MemorySpace.SMEM),   # token ids -> SMEM scalars
            pl.BlockSpec(memory_space=pltpu.MemorySpace.VMEM),   # embedding table (resident)
            pl.BlockSpec(memory_space=pltpu.MemorySpace.VMEM),   # initial [h0; c0]
            pl.BlockSpec(memory_space=pltpu.MemorySpace.VMEM),   # W_ih^T
            pl.BlockSpec(memory_space=pltpu.MemorySpace.VMEM),   # W_hh^T
            pl.BlockSpec(memory_space=pltpu.MemorySpace.VMEM),   # bias
        ],
        out_specs=(
            pl.BlockSpec(memory_space=pltpu.MemorySpace.VMEM),   # (T, H) hidden states
            pl.BlockSpec(memory_space=pltpu.MemorySpace.VMEM),   # (2, H) final [h; c]
        ),
        scratch_shapes=[
            pltpu.VMEM((T, E), jnp.float32),                     # gathered embedding rows
        ],
    )(token_ids.astype(jnp.int32), embedding, state0, w_ih_t, w_hh_t, bias)
    return h_slab, final


class Encoder:
    """JAX/Pallas port of the PyTorch Encoder (embedding + single-layer LSTM)."""

    def __init__(self, embedding_dim, hidden_size, num_embeddings, key):
        self.embedding_dim = embedding_dim
        self.hidden_size = hidden_size
        self.num_embeddings = num_embeddings

        k_emb, k_wih, k_whh, k_bih, k_bhh = jax.random.split(key, 5)

        # nn.Embedding default init: N(0, 1)
        self.embedding = jax.random.normal(
            k_emb, (num_embeddings, embedding_dim), dtype=jnp.float32)

        # nn.LSTM default init: U(-1/sqrt(H), 1/sqrt(H)); torch gate order [i, f, g, o]
        bound = 1.0 / math.sqrt(hidden_size)
        w_ih = jax.random.uniform(
            k_wih, (4 * hidden_size, embedding_dim), jnp.float32, -bound, bound)
        w_hh = jax.random.uniform(
            k_whh, (4 * hidden_size, hidden_size), jnp.float32, -bound, bound)
        b_ih = jax.random.uniform(
            k_bih, (4 * hidden_size,), jnp.float32, -bound, bound)
        b_hh = jax.random.uniform(
            k_bhh, (4 * hidden_size,), jnp.float32, -bound, bound)

        self.w_ih_t = w_ih.T                                        # (E, 4H) f32
        self.w_hh_t = w_hh.T                                        # (H, 4H) f32
        self.bias = (b_ih + b_hh)[None, :].astype(jnp.float32)      # (1, 4H)

        # TODO(synk): batching independent sequences into the matmul M-dim / the second v7x
        # TensorCore is not expressible for this module's batch=1, seq=1 forward signature.

    def init_hidden(self):
        H = self.hidden_size
        return (jnp.zeros((1, 1, H), jnp.float32),
                jnp.zeros((1, 1, H), jnp.float32))

    def forward(self, word_input, hidden):
        """Matches torch: lstm(embedding(word_input).view(1, 1, -1), hidden).

        word_input may be a scalar token (module semantics) or a (T,) token sequence;
        either way the whole recurrence runs in a single pallas_call.
        """
        token_ids = jnp.asarray(word_input, dtype=jnp.int32).reshape(-1)   # (T,)
        T = token_ids.shape[0]
        h0, c0 = hidden
        h_slab, final = lstm_encode_sequence(
            token_ids, h0, c0, self.embedding, self.w_ih_t, self.w_hh_t, self.bias)
        H = self.hidden_size
        output = h_slab.reshape(T, 1, H)            # (seq, batch=1, H)
        h_n = final[0:1].reshape(1, 1, H)
        c_n = final[1:2].reshape(1, 1, H)
        return output, (h_n, c_n)


def _reference_sequence(enc, token_ids, hidden):
    """Pure-JAX f32 reference matching torch.nn.LSTM run token-by-token."""
    H = enc.hidden_size
    h = hidden[0].reshape(1, H)
    c = hidden[1].reshape(1, H)
    outs = []
    for idx in range(token_ids.shape[0]):
        x = enc.embedding[token_ids[idx]].reshape(1, -1)
        gates = x @ enc.w_ih_t + h @ enc.w_hh_t + enc.bias
        i = jax.nn.sigmoid(gates[:, 0 * H:1 * H])
        f = jax.nn.sigmoid(gates[:, 1 * H:2 * H])
        g = jnp.tanh(gates[:, 2 * H:3 * H])
        o = jax.nn.sigmoid(gates[:, 3 * H:4 * H])
        c = f * c + i * g
        h = o * jnp.tanh(c)
        outs.append(h)
    return jnp.stack(outs, axis=0), h, c   # (T,1,H), (1,H), (1,H)


if __name__ == "__main__":
    embedding_dim = 32
    hidden_size = 32
    num_embeddings = 16

    key = jax.random.PRNGKey(0)
    k_enc, k_seq = jax.random.split(key)
    enc = Encoder(embedding_dim, hidden_size, num_embeddings, k_enc)

    # --- single-token forward (exact module semantics) ---
    word_input = jnp.array(3, dtype=jnp.int32)
    hidden = enc.init_hidden()
    output, (h_n, c_n) = enc.forward(word_input, hidden)
    output = jax.block_until_ready(output)
    h_n = jax.block_until_ready(h_n)
    c_n = jax.block_until_ready(c_n)

    assert output.shape == (1, 1, hidden_size)
    assert h_n.shape == (1, 1, hidden_size) and c_n.shape == (1, 1, hidden_size)

    ref_out, ref_h, ref_c = _reference_sequence(enc, word_input.reshape(-1), hidden)
    assert jnp.allclose(output, ref_out, atol=2e-2, rtol=2e-2)
    assert jnp.allclose(h_n.reshape(1, -1), ref_h, atol=2e-2, rtol=2e-2)
    assert jnp.allclose(c_n.reshape(1, -1), ref_c, atol=2e-2, rtol=2e-2)
    assert jnp.allclose(output[-1], h_n[0])   # torch: output[-1] == h_n for 1-layer LSTM

    # --- amortized path: a whole T=8 token sequence in ONE pallas_call ---
    token_ids = jax.random.randint(k_seq, (8,), 0, num_embeddings, dtype=jnp.int32)
    outputs, (h_T, c_T) = enc.forward(token_ids, enc.init_hidden())
    outputs = jax.block_until_ready(outputs)
    h_T = jax.block_until_ready(h_T)
    c_T = jax.block_until_ready(c_T)

    assert outputs.shape == (8, 1, hidden_size)
    ref_out, ref_h, ref_c = _reference_sequence(enc, token_ids, enc.init_hidden())
    assert jnp.allclose(outputs, ref_out, atol=2e-2, rtol=2e-2)
    assert jnp.allclose(h_T.reshape(1, -1), ref_h, atol=2e-2, rtol=2e-2)
    assert jnp.allclose(c_T.reshape(1, -1), ref_c, atol=2e-2, rtol=2e-2)

    print("KERNEL_OK")
</pallas_src>

<mosaic_0001>
module attributes {stable_mosaic.version = 11 : i64} {
  func.func @_encoder_lstm_kernel(%arg0: memref<1xi32, #tpu.memory_space<smem>>, %arg1: memref<16x32xf32, #tpu.memory_space<vmem>>, %arg2: memref<2x32xf32, #tpu.memory_space<vmem>>, %arg3: memref<32x128xf32, #tpu.memory_space<vmem>>, %arg4: memref<32x128xf32, #tpu.memory_space<vmem>>, %arg5: memref<1x128xf32, #tpu.memory_space<vmem>>, %arg6: memref<1x32xf32, #tpu.memory_space<vmem>>, %arg7: memref<2x32xf32, #tpu.memory_space<vmem>>, %arg8: memref<1x32xf32, #tpu.memory_space<vmem>>) attributes {dimension_semantics = [], scalar_prefetch = 0 : i64, scratch_operands = 1 : i64, tpu.core_type = #tpu.core_type<tc>} {
    %c0 = arith.constant 0 : index
    %0 = memref.load %arg0[%c0] : memref<1xi32, #tpu.memory_space<smem>>
    %1 = arith.index_cast %0 : i32 to index
    %c0_0 = arith.constant 0 : index
    %2 = vector.load %arg1[%1, %c0_0] : memref<16x32xf32, #tpu.memory_space<vmem>>, vector<1x32xf32>
    %c0_1 = arith.constant 0 : index
    %c0_2 = arith.constant 0 : index
    %3 = vector.load %arg8[%c0_1, %c0_2] : memref<1x32xf32, #tpu.memory_space<vmem>>, vector<1x32xf32>
    tpu.vector_store %arg8[%c0_1, %c0_2], %2 {strides = array<i32>} : memref<1x32xf32, #tpu.memory_space<vmem>>, vector<1x32xf32>,
    %c0_3 = arith.constant 0 : index
    %c0_4 = arith.constant 0 : index
    %4 = vector.load %arg8[%c0_3, %c0_4] : memref<1x32xf32, #tpu.memory_space<vmem>>, vector<1x32xf32>
    %c0_5 = arith.constant 0 : index
    %c0_6 = arith.constant 0 : index
    %5 = vector.load %arg3[%c0_5, %c0_6] : memref<32x128xf32, #tpu.memory_space<vmem>>, vector<32x128xf32>
    %cst = arith.constant dense<0.000000e+00> : vector<1x128xf32>
    %6 = tpu.matmul %4, %5, %cst {dimension_numbers = #tpu.dot_dimension_numbers<[1], [0], [0], [1], [0, 0, 1, 1], [], []>} : vector<1x32xf32>, vector<32x128xf32>, vector<1x128xf32> -> vector<1x128xf32>
    %c0_7 = arith.constant 0 : index
    %c0_8 = arith.constant 0 : index
    %7 = vector.load %arg5[%c0_7, %c0_8] : memref<1x128xf32, #tpu.memory_space<vmem>>, vector<1x128xf32>
    %8 = arith.addf %6, %7 : vector<1x128xf32>
    %c0_9 = arith.constant 0 : index
    %c0_10 = arith.constant 0 : index
    %9 = vector.load %arg2[%c0_9, %c0_10] : memref<2x32xf32, #tpu.memory_space<vmem>>, vector<1x32xf32>
    %c1 = arith.constant 1 : index
    %c0_11 = arith.constant 0 : index
    %10 = vector.load %arg2[%c1, %c0_11] : memref<2x32xf32, #tpu.memory_space<vmem>>, vector<1x32xf32>
    %c0_12 = arith.constant 0 : index
    %c0_13 = arith.constant 0 : index
    %11 = vector.load %arg4[%c0_12, %c0_13] : memref<32x128xf32, #tpu.memory_space<vmem>>, vector<32x128xf32>
    %cst_14 = arith.constant dense<0.000000e+00> : vector<1x128xf32>
    %12 = tpu.matmul %9, %11, %cst_14 {dimension_numbers = #tpu.dot_dimension_numbers<[1], [0], [0], [1], [0, 0, 1, 1], [], []>} : vector<1x32xf32>, vector<32x128xf32>, vector<1x128xf32> -> vector<1x128xf32>
    %13 = arith.addf %8, %12 : vector<1x128xf32>
    %14 = arith.negf %13 : vector<1x128xf32>
    %15 = math.exp %14 : vector<1x128xf32>
    %cst_15 = arith.constant 1.000000e+00 : f32
    %16 = vector.broadcast %cst_15 : f32 to vector<1x128xf32>
    %17 = arith.addf %16, %15 : vector<1x128xf32>
    %18 = arith.divf %16, %17 : vector<1x128xf32>
    %19 = math.tanh %13 : vector<1x128xf32>
    %20 = vector.extract_strided_slice %18 {offsets = [0, 0], sizes = [1, 32], strides = [1, 1]} : vector<1x128xf32> to vector<1x32xf32>
    %21 = vector.extract_strided_slice %18 {offsets = [0, 32], sizes = [1, 32], strides = [1, 1]} : vector<1x128xf32> to vector<1x32xf32>
    %22 = vector.extract_strided_slice %19 {offsets = [0, 64], sizes = [1, 32], strides = [1, 1]} : vector<1x128xf32> to vector<1x32xf32>
    %23 = vector.extract_strided_slice %18 {offsets = [0, 96], sizes = [1, 32], strides = [1, 1]} : vector<1x128xf32> to vector<1x32xf32>
    %24 = arith.mulf %21, %10 : vector<1x32xf32>
    %25 = arith.mulf %20, %22 : vector<1x32xf32>
    %26 = arith.addf %24, %25 : vector<1x32xf32>
    %27 = math.tanh %26 : vector<1x32xf32>
    %28 = arith.mulf %23, %27 : vector<1x32xf32>
    %c0_16 = arith.constant 0 : index
    %c0_17 = arith.constant 0 : index
    %29 = vector.load %arg6[%c0_16, %c0_17] : memref<1x32xf32, #tpu.memory_space<vmem>>, vector<1x32xf32>
    tpu.vector_store %arg6[%c0_16, %c0_17], %28 {strides = array<i32>} : memref<1x32xf32, #tpu.memory_space<vmem>>, vector<1x32xf32>,
    %c0_18 = arith.constant 0 : index
    %c0_19 = arith.constant 0 : index
    %30 = vector.load %arg7[%c0_18, %c0_19] : memref<2x32xf32, #tpu.memory_space<vmem>>, vector<1x32xf32>
    tpu.vector_store %arg7[%c0_18, %c0_19], %28 {strides = array<i32>} : memref<2x32xf32, #tpu.memory_space<vmem>>, vector<1x32xf32>,
    %c1_20 = arith.constant 1 : index
    %c0_21 = arith.constant 0 : index
    %31 = vector.load %arg7[%c1_20, %c0_21] : memref<2x32xf32, #tpu.memory_space<vmem>>, vector<1x32xf32>
    tpu.vector_store %arg7[%c1_20, %c0_21], %26 {strides = array<i32>} : memref<2x32xf32, #tpu.memory_space<vmem>>, vector<1x32xf32>,
    return
  }
}

</mosaic_0001>

<bundles_post_ra>
// kernel: tpu_custom_call.1
= control target key start
LH: loop header
LB: loop body
LE: loop exit
PB: predicated region body
PF: predicated region fallthrough
CT: control target
= control target key end

     0   :  { %14 = vsyncpa [#allocation5], 0  ;;  %s550_s0 = inlined_call_operand.<no memory space> [shape: s32[1], index: 0, kind: input, shape index: {}]   ;;  %s551_s1 = inlined_call_operand.hbm [shape: f32[16,32], index: 1, kind: input, shape index: {}]   ;;  %s552_s2 = inlined_call_operand.vmem [shape: f32[2,32], index: 2, kind: input, shape index: {}]   ;;  %s553_s3 = inlined_call_operand.hbm [shape: f32[32,128], index: 3, kind: input, shape index: {}]   ;;  %s554_s4 = inlined_call_operand.hbm [shape: f32[32,128], index: 4, kind: input, shape index: {}]   ;;  %s555_s5 = inlined_call_operand.vmem [shape: f32[1,128], index: 5, kind: input, shape index: {}]   ;;  %s556_s6 = inlined_call_operand.hbm [shape: f32[1,32], index: 6, kind: output, shape index: {0}]   ;;  %s557_s7 = inlined_call_operand.hbm [shape: f32[2,32], index: 7, kind: output, shape index: {1}]  }
   0x1   :  { %15 = vsyncpa [#allocation8], 0 }
   0x2   :  { %16 = vsyncpa [#allocation6], 0 }
   0x3   :  { %17 = vsyncpa [#allocation12], 0  ;;  %s467_s24 = smov [#allocation7]   ;;  %s468_s26 = smov [#allocation4]  }
   0x4   :  { %s39_s25 = sshll.u32 %s467_s24, 4  ;;  %s25_s27 = sshll.u32 %s468_s26, 4  ;;  %s40_s25 = int_to_ptr.vmem [resolvable:$true] %s39_s25  ;;  %s26_s27 = int_to_ptr.vmem [resolvable:$true] %s25_s27 }
   0x5   :  { %s367_s28 = scalar_lea.vmem %s40_s25, 512  ;;  %p372_p1 = scmp.lt.s32.totalorder %s40_s25, %s40_s25 }
   0x6   :  { %p368_p0 = scmp.ne.s32.totalorder %s40_s25, %s367_s28  ;;  %p373_p2 = scmp.lt.s32.totalorder %s367_s28, %s367_s28 }
   0x8   :  { %p374_p3 = por %p373_p2, %p372_p1 }
   0xa   :  { %p375_p4 = pnand %p374_p3, %p368_p0 }
   0xc   :  { %378 = shalt.err (!%p375_p4)
}
   0xd   :  { %s469_s29 = smov 128   ;;  %s470_s30 = smov 8  }
   0xe   :  { %45 = dma.hbm_to_vmem [thread:$0]  %s553_s3, 512, %s40_s25, [#allocation8], %s469_s29, %s469_s29, %s470_s30  }
   0xf   :  { %s387_s10 = scalar_lea.vmem %s26_s27, 256  ;;  %p392_p6 = scmp.lt.s32.totalorder %s26_s27, %s26_s27 }
  0x10   :  { %p388_p5 = scmp.ne.s32.totalorder %s26_s27, %s387_s10  ;;  %p393_p7 = scmp.lt.s32.totalorder %s387_s10, %s387_s10 }
  0x12   :  { %p394_p8 = por %p393_p7, %p392_p6 }
  0x14   :  { %p395_p9 = pnand %p394_p8, %p388_p5 }
  0x16   :  { %398 = shalt.err (!%p395_p9)
}
  0x17   :  { %31 = dma.hbm_to_vmem [thread:$0]  %s551_s1, 256, %s26_s27, [#allocation5], %s469_s29, %s469_s29, %s470_s30  }
  0x18   :  { %s471_s13 = smov [#allocation9]  }
  0x19   :  { %s51_s14 = sshll.u32 %s471_s13, 4  ;;  %s52_s14 = int_to_ptr.vmem [resolvable:$true] %s51_s14 }
  0x1a   :  { %s407_s15 = scalar_lea.vmem %s52_s14, 512  ;;  %p412_p11 = scmp.lt.s32.totalorder %s52_s14, %s52_s14 }
  0x1b   :  { %p408_p10 = scmp.ne.s32.totalorder %s52_s14, %s407_s15  ;;  %p413_p12 = scmp.lt.s32.totalorder %s407_s15, %s407_s15 }
  0x1d   :  { %p414_p13 = por %p413_p12, %p412_p11 }
  0x1f   :  { %p415_p0 = pnand %p414_p13, %p408_p10 }
  0x21   :  { %418 = shalt.err (!%p415_p0)
}
  0x22   :  { %57 = dma.hbm_to_vmem [thread:$0]  %s554_s4, 512, %s52_s14, [#allocation8], %s469_s29, %s469_s29, %s470_s30  }
  0x23   :  { %459 = dma.done.wait [#allocation5], 256  }
  0x24   :  { %460 = vsyncadd [#allocation5], 4294967040 }
  0x25   :  { %461 = dma.done.wait [#allocation8], 1024  }
  0x26   :  { %462 = vsyncadd [#allocation8], 4294966272  ;;  %v472_v0 = vmov 0.0   ;;  %vm473_vm0 = vmmov 0   ;;  %v78_v1 = vld [vmem:[#allocation7 + $0x18] sm:$0xff]  ;;  %v77_v3 = vld [vmem:[#allocation7 + $0x10] sm:$0xff] }
  0x27   :  { %317 = vmatprep.subr.mxu0 %v472_v0  ;;  %328 = vmatprep.subr.mxu1 %v472_v0  ;;  %v159_v2 = vld [vmem:[#allocation9 + $0x18] sm:$0xff]  ;;  %vm72_vm1 = vcmask 253952   ;;  %v158_v4 = vld [vmem:[#allocation9 + $0x10] sm:$0xff]  ;;  %v76_v5 = vld [vmem:[#allocation7 + $0x8] sm:$0xff]  ;;  %s70_s17 = scalar_lea.vmem [#allocation4], %s550_s0  ;;  %vm80_vm2 = vcmask 261120  }
  0x28   :  { %325 = vmatprep.mubr.msk.f32.mxu0 %vm473_vm0, %v472_v0  ;;  %336 = vmatprep.mubr.msk.f32.mxu1 %vm473_vm0, %v472_v0  ;;  %v157_v6 = vld [vmem:[#allocation9 + $0x8] sm:$0xff]  ;;  %v75_v8 = vld [vmem:[#allocation7] sm:$0xff]  ;;  %s474_s21 = smov 64   ;;  %v155_v20 = vld [vmem:[%s552_s2 + $0x1] sm:$0x1]  ;;  %s475_s24 = smov 32  }
  0x29   :  { %318 = vmatpush3.msra.mxu0 %v78_v1  ;;  %329 = vmatpush3.msra.mxu1 %v159_v2  ;;  %v71_v7 = vld [vmem:[%s70_s17] sm:$0x1]  ;;  %v156_v9 = vld [vmem:[#allocation9] sm:$0xff]  ;;  %s478_s26 = smov [#allocation11]  }
  0x2a   :  { %319 = vmatprep.subr.mxu0 %v472_v0  ;;  %330 = vmatprep.subr.mxu1 %v472_v0  ;;  %73 = vst.msk [vmem:[#allocation2] sm:$0x1] %vm72_vm1, %v71_v7  ;;  %v154_v10 = vld [vmem:[%s552_s2] sm:$0x1]  ;;  %s477_s2 = smov [#allocation10]   ;;  %s289_s27 = sshll.u32 %s478_s26, 4  ;;  %s290_s27 = int_to_ptr.vmem [resolvable:$true] %s289_s27 }
  0x2b   :  { %320 = vmatpush3.msra.mxu0 %v77_v3  ;;  %331 = vmatpush3.msra.mxu1 %v158_v4  ;;  %v79_v13 = vld [vmem:[%s555_s5] sm:$0x1]  ;;  %s476_s5 = smov 96   ;;  %s279_s25 = sshll.u32 %s477_s2, 4  ;;  %s280_s25 = int_to_ptr.vmem [resolvable:$true] %s279_s25 }
  0x2c   :  { %321 = vmatprep.subr.mxu0 %v472_v0  ;;  %332 = vmatprep.subr.mxu1 %v472_v0  ;;  %s419_s28 = scalar_lea.vmem %s280_s25, 16  ;;  %s423_s29 = scalar_lea.vmem %s280_s25, 32 }
  0x2d   :  { %322 = vmatpush3.msra.mxu0 %v76_v5  ;;  %333 = vmatpush3.msra.mxu1 %v157_v6  ;;  %p420_p1 = scmp.ne.s32.totalorder %s280_s25, %s419_s28  ;;  %p424_p2 = scmp.lt.s32.totalorder %s280_s25, %s280_s25 }
  0x2e   :  { %323 = vmatprep.subr.mxu0 %v472_v0  ;;  %334 = vmatprep.subr.mxu1 %v472_v0  ;;  %p425_p3 = scmp.lt.s32.totalorder %s423_s29, %s419_s28 }
  0x2f   :  { %324 = vmatpush3.msra.mxu0 %v75_v8  ;;  %335 = vmatpush3.msra.mxu1 %v156_v9 }
  0x30   :  { %337 = vmatmul.mubr.msk.f32.vlgmr.msra.gmra.mxu1 %vm80_vm2, %v154_v10  ;;  %p426_p4 = por %p425_p3, %p424_p2 }
  0x31   :  { %v74_v11 = vld [vmem:[#allocation2] sm:$0x1] }
  0x32   :  { %326 = vmatmul.mubr.msk.f32.vlgmr.msra.gmra.mxu0 %vm80_vm2, %v74_v11  ;;  %p427_p5 = pnand %p426_p4, %p420_p1 }
  0xf0   :  { %v229_v12 = vpop.f32.mrf.mxu1 }
  0xf2   :  { %v338_v14 = vpop.f32.mrf.mxu1  ;;  %v150_v15 = vpop.f32.mrf.mxu0 }
  0xf3   :  { %v151_v16 = vadd.f32 %v150_v15, %v79_v13 }
  0xf4   :  { %v327_v17 = vpop.f32.mrf.mxu0 }
  0xf5   :  { %v233_v18 = vadd.f32 %v229_v12, %v151_v16 }
  0xf7   :  { %351 = vtanh.f32 %v233_v18  ;;  %v306_v21 = vmul.f32 -1.442695, %v233_v18 }
  0xf9   :  { %353 = vpow2.f32 %v306_v21 }
 0x104   :  { %v352_v19 = vpop.eup %351 }
 0x105   :  { %247 = vrot.lane.b32.xlu0 %v352_v19, %s474_s21 }
 0x106   :  { %v354_v22 = vpop.eup %353 }
 0x107   :  { %v237_v23 = vadd.f32 1.0, %v354_v22 }
 0x109   :  { %242 = vrot.lane.b32.xlu0 %v155_v20, %s475_s24  ;;  %355 = vrcp.f32 %v237_v23 }
 0x116   :  { %v356_v24 = vpop.eup %355 }
 0x177   :  { %v248_v25 = vpop.permute.xlu0 %247 }
 0x178   :  { %v250_v26 = vmul.f32 %v356_v24, %v248_v25 }
 0x17a   :  { %252 = vrot.lane.b32.xlu1 %v250_v26, %s475_s24 }
 0x17b   :  { %v243_v27 = vpop.permute.xlu0 %242 }
 0x17c   :  { %v245_v28 = vmul.f32 %v356_v24, %v243_v27 }
 0x1ec   :  { %v253_v29 = vpop.permute.xlu1 %252 }
 0x1ed   :  { %v255_v30 = vadd.f32 %v253_v29, %v245_v28 }
 0x1ef   :  { %357 = vtanh.f32 %v255_v30 }
 0x1fc   :  { %v358_v31 = vpop.eup %357 }
 0x1fd   :  { %258 = vrot.lane.b32.xlu1 %v358_v31, %s474_s21 }
 0x201   :  { %269 = vrot.lane.b32.xlu1 %v255_v30, %s476_s5 }
 0x26f   :  { %v259_v32 = vpop.permute.xlu1 %258 }
 0x270   :  { %v261_v33 = vmul.f32 %v356_v24, %v259_v32 }
 0x272   :  { %263 = vrot.lane.b32.xlu0 %v261_v33, %s475_s24 }
 0x273   :  { %v270_v34 = vpop.permute.xlu1 %269 }
 0x274   :  { %272 = vst.msk [vmem:[#allocation11 + $0x1] sm:$0x1] %vm72_vm1, %v270_v34 }
 0x2e4   :  { %v264_v35 = vpop.permute.xlu0 %263 }
 0x2e5   :  { %267 = vst.msk [vmem:[#allocation11] sm:$0x1] %vm72_vm1, %v264_v35  ;;  %266 = vst.msk [vmem:[#allocation10] sm:$0x1] %vm72_vm1, %v264_v35 }
 0x2e6   :  { %430 = shalt.err (!%p427_p5)
}
 0x2e7   :  { %282 = dma.vmem_to_hbm [thread:$0]  %s280_s25, 16, %s556_s6, [#allocation6]  }
 0x2e8   :  { %s439_s9 = scalar_lea.vmem %s290_s27, 32  ;;  %p444_p7 = scmp.lt.s32.totalorder %s290_s27, %s290_s27 }
 0x2e9   :  { %p440_p6 = scmp.ne.s32.totalorder %s290_s27, %s439_s9  ;;  %p445_p8 = scmp.lt.s32.totalorder %s439_s9, %s439_s9 }
 0x2eb   :  { %p446_p9 = por %p445_p8, %p444_p7 }
 0x2ed   :  { %p447_p10 = pnand %p446_p9, %p440_p6 }
 0x2ef   :  { %450 = shalt.err (!%p447_p10)
}
 0x2f0   :  { %292 = dma.vmem_to_hbm [thread:$0]  %s290_s27, 32, %s557_s7, [#allocation12]  }
 0x2f1   :  { %463 = dma.done.wait [#allocation6], 16  }
 0x2f2   :  { %464 = vsyncadd [#allocation6], 4294967280 }
 0x2f3   :  { %465 = dma.done.wait [#allocation12], 32  }
 0x2f4   :  { %466 = vsyncadd [#allocation12], 4294967264 }
 0x2f5   :  { %299 = vsyncpa [#allocation5], 1 }
 0x2f6   :  { %300 = vsyncpa [#allocation8], 1 }
 0x2f7   :  { %301 = vsyncpa [#allocation6], 1 }
 0x2f8   :  { %302 = vsyncpa [#allocation12], 1 }

</bundles_post_ra>
